<compile_context>
chip_gen: v5e
topology: v5e:2x2
jax: 0.10.0
libtpu: 0.0.40
codegen_flags: <defaults>
</compile_context>

<pallas_src>
import functools

import numpy as np

import jax
import jax.numpy as jnp
from jax.experimental import pallas as pl
from jax.experimental.pallas import tpu as pltpu

C_PAD = 128        # lane-dense padded class dimension (one 128-lane vreg)
NEG_PAD = -1e30    # finite "minus infinity" for pad logits (avoids inf*0 -> NaN)


# ----------------------------------------------------------------------------
# Synthetic labelmap: levels, level offsets and group structure.
# Each "group" is one nn.Linear of the original module:
#   (col_start_in_all_log_probs, n_children, parent_column_or_None)
# ----------------------------------------------------------------------------
def build_labelmap():
    levels = [3, 6, 12]
    level_start, level_stop = [], []
    for lid, level_len in enumerate(levels):
        if lid == 0:
            level_start.append(0)
            level_stop.append(level_len)
        else:
            level_start.append(level_stop[lid - 1])
            level_stop.append(level_stop[lid - 1] + level_len)
    n_classes = level_stop[-1]

    groups = [(level_start[0], levels[0], None)]  # 'root' linear
    for lid in range(1, len(levels)):
        n_parents = levels[lid - 1]
        nchild = levels[lid] // n_parents  # uniform fan-out in this synthetic tree
        for p in range(n_parents):
            start = level_start[lid] + p * nchild
            parent_col = level_start[lid - 1] + p
            groups.append((start, nchild, parent_col))
    return levels, level_start, level_stop, n_classes, tuple(groups)


# ----------------------------------------------------------------------------
# Constant matrices (numpy, cached on the group structure):
#   S   (C_PAD, C_PAD): S[c, g] = 1 if valid class c belongs to group g.
#   M   (C_PAD, C_PAD): M[r, c] = 1 if r == c or r is an ancestor class of c.
#   STM (C_PAD, C_PAD): S^T @ M (entries are exactly 0/1: one ancestor per level).
#   gid (1, C_PAD) int32: group id per class, -1 for pad columns.
# Pad rows/columns are all-zero, so pad lanes never contribute.
# ----------------------------------------------------------------------------
@functools.lru_cache(maxsize=None)
def _build_constants(groups, n_classes, c_pad=C_PAD):
    group_of = np.full(c_pad, -1, np.int64)
    parent_of = np.full(n_classes, -1, np.int64)
    for g, (start, size, pcol) in enumerate(groups):
        group_of[start:start + size] = g
        parent_of[start:start + size] = -1 if pcol is None else pcol

    S = np.zeros((c_pad, c_pad), np.float32)
    for c in range(n_classes):
        S[c, group_of[c]] = 1.0

    M = np.zeros((c_pad, c_pad), np.float32)
    for c in range(n_classes):
        a = c
        while a != -1:
            M[a, c] = 1.0
            a = int(parent_of[a])

    STM = np.ascontiguousarray(S.T @ M).astype(np.float32)   # exact 0/1 values
    gid = group_of.reshape(1, c_pad).astype(np.int32)
    return S, M, STM, gid


def _cdiv(a, b):
    return -(-a // b)


def _round_up(n, m):
    return ((n + m - 1) // m) * m


# ----------------------------------------------------------------------------
# Pallas kernel factory.  One logits matmul, one exp pass, MXU-based segmented
# log-sum-exp, MXU-based ancestor accumulation, compact (n_classes-wide) stores.
# ----------------------------------------------------------------------------
def _make_kernel(n_classes, last_start, last_stop, n_groups, per_group, op_dtype):

    def kernel(x_ref, w_ref, b_ref, seg_ref, anc_ref, seg_anc_ref, gid_ref,
               out_ref, leaf_ref):
        x = x_ref[...].astype(op_dtype)                               # (TB, D)
        logits = jnp.dot(x, w_ref[...],
                         preferred_element_type=jnp.float32) + b_ref[...]  # (TB,128) f32

        if per_group:
            # Exact per-group stabilizer: short static unroll over ~n_groups
            # masked row-maxes (robust to arbitrary logit dynamic range).
            gid = gid_ref[...]                                        # (1, 128) int32
            m = jnp.zeros_like(logits)
            for g in range(n_groups):
                mask = gid == g
                mg = jnp.max(jnp.where(mask, logits, NEG_PAD), axis=1, keepdims=True)
                m = jnp.where(mask, mg, m)
        else:
            # Single global row max (pad logits sit at -1e30 so they never win).
            # Valid while each group's max logit is within ~88 of the row max
            # (f32 exp underflow headroom).
            m = jnp.max(logits, axis=1, keepdims=True)

        shifted = logits - m                                          # f32
        shifted_mx = shifted.astype(op_dtype)                         # MXU operand

        e = jnp.exp(shifted)                                          # EUP, f32; pads -> 0
        gsum = jnp.dot(e.astype(op_dtype), seg_ref[...],
                       preferred_element_type=jnp.float32)            # per-group sums
        log_gsum = jnp.where(gsum > 0.0, jnp.log(gsum), 0.0)          # sanitize unused cols

        # out[c] = sum over ancestors-or-self(c) of (shifted - per-group LSE)
        out = (jnp.dot(shifted_mx, anc_ref[...],
                       preferred_element_type=jnp.float32)
               - jnp.dot(log_gsum.astype(op_dtype), seg_anc_ref[...],
                         preferred_element_type=jnp.float32))          # (TB, 128)

        out_ref[...] = out[:, :n_classes]                              # compact store
        leaf_ref[...] = out[:, last_start:last_stop]                   # leaf-level store

    return kernel


# ----------------------------------------------------------------------------
# Public wrapper (jit-ed; tree metadata static, constants cached).
# ----------------------------------------------------------------------------
@functools.partial(
    jax.jit,
    static_argnames=("groups", "n_classes", "last_start", "last_stop",
                     "block_b", "operand_dtype", "per_group_stabilizer"))
def hierarchical_softmax(x, w, b, *, groups, n_classes, last_start, last_stop,
                         block_b=1024, operand_dtype=jnp.bfloat16,
                         per_group_stabilizer=False):
    """Returns (all_log_probs (B, n_classes), leaf_log_probs (B, n_leaf))."""
    B, D = x.shape
    n_leaf = last_stop - last_start

    # Batch tiling: big tiles (per-step overhead ~0.35us amortizes, HBM-stream
    # roofline), minimal pad waste, and >= 2 grid steps for moderate B so both
    # v7x TensorCores are fed.
    n_tiles = max(1, _cdiv(B, block_b))
    if n_tiles == 1 and B >= 16:
        n_tiles = 2
    TB = _round_up(_cdiv(B, n_tiles), 8)
    B_pad = _round_up(B, TB)

    x_in = x.astype(jnp.float32)
    if B_pad != B:
        x_in = jnp.pad(x_in, ((0, B_pad - B), (0, 0)))

    # Packed parameters: class dim padded 21 -> 128; pad weights 0, pad bias -1e30.
    w_pad = jnp.pad(w.astype(jnp.float32),
                    ((0, 0), (0, C_PAD - n_classes))).astype(operand_dtype)
    b_pad = jnp.pad(b.astype(jnp.float32), (0, C_PAD - n_classes),
                    constant_values=NEG_PAD).reshape(1, C_PAD)

    S_np, M_np, STM_np, gid_np = _build_constants(groups, n_classes, C_PAD)
    S = jnp.asarray(S_np, dtype=operand_dtype)        # 0/1 -> exact in bf16
    M = jnp.asarray(M_np, dtype=operand_dtype)
    STM = jnp.asarray(STM_np, dtype=operand_dtype)
    gid = jnp.asarray(gid_np)

    kernel = _make_kernel(n_classes, last_start, last_stop, len(groups),
                          per_group_stabilizer, operand_dtype)

    const_spec = pl.BlockSpec((C_PAD, C_PAD), lambda i: (0, 0))
    out_pad, leaf_pad = pl.pallas_call(
        kernel,
        grid=(B_pad // TB,),
        in_specs=[
            pl.BlockSpec((TB, D), lambda i: (i, 0)),         # x: tiled over batch
            pl.BlockSpec((D, C_PAD), lambda i: (0, 0)),      # W: resident
            pl.BlockSpec((1, C_PAD), lambda i: (0, 0)),      # bias: resident
            const_spec,                                      # S
            const_spec,                                      # M (ancestor matrix)
            const_spec,                                      # S^T @ M
            pl.BlockSpec((1, C_PAD), lambda i: (0, 0)),      # gid (per-class group id)
        ],
        out_specs=[
            pl.BlockSpec((TB, n_classes), lambda i: (i, 0)),  # compact all-log-probs
            pl.BlockSpec((TB, n_leaf), lambda i: (i, 0)),     # leaf-level log-probs
        ],
        out_shape=(jax.ShapeDtypeStruct((B_pad, n_classes), jnp.float32),
                   jax.ShapeDtypeStruct((B_pad, n_leaf), jnp.float32)),
        compiler_params=pltpu.CompilerParams(
            dimension_semantics=("parallel",)),              # batch splits across TCs
    )(x_in, w_pad, b_pad, S, M, STM, gid)

    if B_pad != B:
        out_pad, leaf_pad = out_pad[:B], leaf_pad[:B]
    return out_pad, leaf_pad


# ----------------------------------------------------------------------------
# Pure-JAX reference (mirrors the PyTorch forward loop) for verification.
# ----------------------------------------------------------------------------
def reference(x, w, b, groups, n_classes):
    logits = x @ w + b[None, :]
    out = jnp.zeros((x.shape[0], n_classes), jnp.float32)
    for start, size, parent_col in groups:
        seg = logits[:, start:start + size]
        logp = jax.nn.log_softmax(seg, axis=1)
        if parent_col is not None:
            logp = logp + out[:, parent_col:parent_col + 1]
        out = out.at[:, start:start + size].set(logp)
    return out


if __name__ == "__main__":
    levels, level_start, level_stop, n_classes, groups = build_labelmap()

    B, D = 8, 32  # batch, input_size (penultimate feature dim)
    key = jax.random.PRNGKey(0)
    kx, kw, kb = jax.random.split(key, 3)
    x = jax.random.normal(kx, (B, D), jnp.float32)
    # Deterministic packed parameters (per-node nn.Linear weights packed
    # column-per-class into one (D, n_classes) matrix).
    w = jax.random.normal(kw, (D, n_classes), jnp.float32) * (1.0 / jnp.sqrt(D))
    b = jax.random.normal(kb, (n_classes,), jnp.float32) * 0.01

    common = dict(groups=groups, n_classes=n_classes,
                  last_start=level_start[-1], last_stop=level_stop[-1])

    # Default fast path: bf16 matmul operands + single global stabilizer.
    all_lp, leaf_lp = hierarchical_softmax(x, w, b, **common)
    jax.block_until_ready((all_lp, leaf_lp))

    ref = reference(x, w, b, groups, n_classes)
    assert all_lp.shape == (B, n_classes)
    assert leaf_lp.shape == (B, levels[-1])
    assert bool(jnp.all(jnp.isfinite(all_lp)))
    # Tolerances account for bf16 operand precision on the MXU (the f32 reference
    # matmul also runs at default bf16-pass precision on TPU).
    assert jnp.allclose(all_lp, ref, atol=5e-2, rtol=5e-2)
    assert jnp.allclose(leaf_lp, ref[:, level_start[-1]:level_stop[-1]],
                        atol=5e-2, rtol=5e-2)
    # Structural check: root-level probabilities normalize to 1.
    root_lse = jax.scipy.special.logsumexp(all_lp[:, :levels[0]], axis=1)
    assert bool(jnp.max(jnp.abs(root_lse)) < 5e-2)

    # Robust path: f32 operands + exact per-group stabilizer.
    all_lp2, leaf_lp2 = hierarchical_softmax(
        x, w, b, operand_dtype=jnp.float32, per_group_stabilizer=True, **common)
    jax.block_until_ready((all_lp2, leaf_lp2))
    assert jnp.allclose(all_lp2, ref, atol=5e-2, rtol=5e-2)
    assert jnp.allclose(leaf_lp2, ref[:, level_start[-1]:level_stop[-1]],
                        atol=5e-2, rtol=5e-2)

    print("KERNEL_OK")
</pallas_src>

<mosaic_0001>
module attributes {stable_mosaic.version = 11 : i64} {
  func.func @kernel(%arg0: i32, %arg1: memref<8x32xf32, #tpu.memory_space<vmem>>, %arg2: memref<32x128xbf16, #tpu.memory_space<vmem>>, %arg3: memref<1x128xf32, #tpu.memory_space<vmem>>, %arg4: memref<128x128xbf16, #tpu.memory_space<vmem>>, %arg5: memref<128x128xbf16, #tpu.memory_space<vmem>>, %arg6: memref<128x128xbf16, #tpu.memory_space<vmem>>, %arg7: memref<1x128xi32, #tpu.memory_space<vmem>>, %arg8: memref<8x21xf32, #tpu.memory_space<vmem>>, %arg9: memref<8x12xf32, #tpu.memory_space<vmem>>) attributes {dimension_semantics = [#tpu.dimension_semantics<parallel>], iteration_bounds = array<i64: 1>, scalar_prefetch = 0 : i64, scratch_operands = 0 : i64, tpu.core_type = #tpu.core_type<tc>, window_params = [{transform_indices = @transform_0, window_bounds = array<i64: 8, 32>}, {pipeline_mode = #tpu.pipeline_mode<synchronous>, transform_indices = @transform_1, window_bounds = array<i64: 32, 128>}, {pipeline_mode = #tpu.pipeline_mode<synchronous>, transform_indices = @transform_2, window_bounds = array<i64: 1, 128>}, {pipeline_mode = #tpu.pipeline_mode<synchronous>, transform_indices = @transform_3, window_bounds = array<i64: 128, 128>}, {pipeline_mode = #tpu.pipeline_mode<synchronous>, transform_indices = @transform_4, window_bounds = array<i64: 128, 128>}, {pipeline_mode = #tpu.pipeline_mode<synchronous>, transform_indices = @transform_5, window_bounds = array<i64: 128, 128>}, {pipeline_mode = #tpu.pipeline_mode<synchronous>, transform_indices = @transform_6, window_bounds = array<i64: 1, 128>}, {transform_indices = @transform_7, window_bounds = array<i64: 8, 21>}, {transform_indices = @transform_8, window_bounds = array<i64: 8, 12>}]} {
    %c0 = arith.constant 0 : index
    %c0_0 = arith.constant 0 : index
    %0 = vector.load %arg1[%c0, %c0_0] : memref<8x32xf32, #tpu.memory_space<vmem>>, vector<8x32xf32>
    %1 = arith.truncf %0 : vector<8x32xf32> to vector<8x32xbf16>
    %c0_1 = arith.constant 0 : index
    %c0_2 = arith.constant 0 : index
    %2 = vector.load %arg2[%c0_1, %c0_2] : memref<32x128xbf16, #tpu.memory_space<vmem>>, vector<32x128xbf16>
    %cst = arith.constant dense<0.000000e+00> : vector<8x128xf32>
    %3 = tpu.matmul %1, %2, %cst {dimension_numbers = #tpu.dot_dimension_numbers<[1], [0], [0], [1], [0, 0, 1, 1], [], []>} : vector<8x32xbf16>, vector<32x128xbf16>, vector<8x128xf32> -> vector<8x128xf32>
    %c0_3 = arith.constant 0 : index
    %c0_4 = arith.constant 0 : index
    %4 = vector.load %arg3[%c0_3, %c0_4] : memref<1x128xf32, #tpu.memory_space<vmem>>, vector<1x128xf32>
    %5 = vector.broadcast %4 : vector<1x128xf32> to vector<8x128xf32>
    %6 = arith.addf %3, %5 : vector<8x128xf32>
    %cst_5 = arith.constant dense<0xFF800000> : vector<8xf32>
    %7 = vector.multi_reduction <maximumf>, %6, %cst_5 [1] : vector<8x128xf32> to vector<8xf32>
    %8 = vector.shape_cast %7 : vector<8xf32> to vector<8x1xf32>
    %9 = vector.broadcast %8 : vector<8x1xf32> to vector<8x128xf32>
    %10 = arith.subf %6, %9 : vector<8x128xf32>
    %11 = arith.truncf %10 : vector<8x128xf32> to vector<8x128xbf16>
    %12 = math.exp %10 : vector<8x128xf32>
    %13 = arith.truncf %12 : vector<8x128xf32> to vector<8x128xbf16>
    %c0_6 = arith.constant 0 : index
    %c0_7 = arith.constant 0 : index
    %14 = vector.load %arg4[%c0_6, %c0_7] : memref<128x128xbf16, #tpu.memory_space<vmem>>, vector<128x128xbf16>
    %cst_8 = arith.constant dense<0.000000e+00> : vector<8x128xf32>
    %15 = tpu.matmul %13, %14, %cst_8 {dimension_numbers = #tpu.dot_dimension_numbers<[1], [0], [0], [1], [0, 0, 1, 1], [], []>} : vector<8x128xbf16>, vector<128x128xbf16>, vector<8x128xf32> -> vector<8x128xf32>
    %cst_9 = arith.constant 0.000000e+00 : f32
    %16 = vector.broadcast %cst_9 : f32 to vector<8x128xf32>
    %17 = arith.cmpf ogt, %15, %16 : vector<8x128xf32>
    %18 = math.log %15 : vector<8x128xf32>
    %cst_10 = arith.constant 0.000000e+00 : f32
    %19 = vector.broadcast %cst_10 : f32 to vector<8x128xf32>
    %20 = arith.select %17, %18, %19 : vector<8x128xi1>, vector<8x128xf32>
    %c0_11 = arith.constant 0 : index
    %c0_12 = arith.constant 0 : index
    %21 = vector.load %arg5[%c0_11, %c0_12] : memref<128x128xbf16, #tpu.memory_space<vmem>>, vector<128x128xbf16>
    %cst_13 = arith.constant dense<0.000000e+00> : vector<8x128xf32>
    %22 = tpu.matmul %11, %21, %cst_13 {dimension_numbers = #tpu.dot_dimension_numbers<[1], [0], [0], [1], [0, 0, 1, 1], [], []>} : vector<8x128xbf16>, vector<128x128xbf16>, vector<8x128xf32> -> vector<8x128xf32>
    %23 = arith.truncf %20 : vector<8x128xf32> to vector<8x128xbf16>
    %c0_14 = arith.constant 0 : index
    %c0_15 = arith.constant 0 : index
    %24 = vector.load %arg6[%c0_14, %c0_15] : memref<128x128xbf16, #tpu.memory_space<vmem>>, vector<128x128xbf16>
    %cst_16 = arith.constant dense<0.000000e+00> : vector<8x128xf32>
    %25 = tpu.matmul %23, %24, %cst_16 {dimension_numbers = #tpu.dot_dimension_numbers<[1], [0], [0], [1], [0, 0, 1, 1], [], []>} : vector<8x128xbf16>, vector<128x128xbf16>, vector<8x128xf32> -> vector<8x128xf32>
    %26 = arith.subf %22, %25 : vector<8x128xf32>
    %27 = vector.extract_strided_slice %26 {offsets = [0, 0], sizes = [8, 21], strides = [1, 1]} : vector<8x128xf32> to vector<8x21xf32>
    %c0_17 = arith.constant 0 : index
    %c0_18 = arith.constant 0 : index
    %28 = vector.load %arg8[%c0_17, %c0_18] : memref<8x21xf32, #tpu.memory_space<vmem>>, vector<8x21xf32>
    tpu.vector_store %arg8[%c0_17, %c0_18], %27 {strides = array<i32>} : memref<8x21xf32, #tpu.memory_space<vmem>>, vector<8x21xf32>,
    %29 = vector.extract_strided_slice %26 {offsets = [0, 9], sizes = [8, 12], strides = [1, 1]} : vector<8x128xf32> to vector<8x12xf32>
    %c0_19 = arith.constant 0 : index
    %c0_20 = arith.constant 0 : index
    %30 = vector.load %arg9[%c0_19, %c0_20] : memref<8x12xf32, #tpu.memory_space<vmem>>, vector<8x12xf32>
    tpu.vector_store %arg9[%c0_19, %c0_20], %29 {strides = array<i32>} : memref<8x12xf32, #tpu.memory_space<vmem>>, vector<8x12xf32>,
    return
  }
  func.func @transform_0(%arg0: i32) -> (i32, i32) {
    %c0_i32 = arith.constant 0 : i32
    %c0_i32_0 = arith.constant 0 : i32
    return %arg0, %c0_i32 : i32, i32
  }
  func.func @transform_1(%arg0: i32) -> (i32, i32) {
    %c0_i32 = arith.constant 0 : i32
    %c0_i32_0 = arith.constant 0 : i32
    %c0_i32_1 = arith.constant 0 : i32
    return %c0_i32, %c0_i32_0 : i32, i32
  }
  func.func @transform_2(%arg0: i32) -> (i32, i32) {
    %c0_i32 = arith.constant 0 : i32
    %c0_i32_0 = arith.constant 0 : i32
    %c0_i32_1 = arith.constant 0 : i32
    return %c0_i32, %c0_i32_0 : i32, i32
  }
  func.func @transform_3(%arg0: i32) -> (i32, i32) {
    %c0_i32 = arith.constant 0 : i32
    %c0_i32_0 = arith.constant 0 : i32
    %c0_i32_1 = arith.constant 0 : i32
    return %c0_i32, %c0_i32_0 : i32, i32
  }
  func.func @transform_4(%arg0: i32) -> (i32, i32) {
    %c0_i32 = arith.constant 0 : i32
    %c0_i32_0 = arith.constant 0 : i32
    %c0_i32_1 = arith.constant 0 : i32
    return %c0_i32, %c0_i32_0 : i32, i32
  }
  func.func @transform_5(%arg0: i32) -> (i32, i32) {
    %c0_i32 = arith.constant 0 : i32
    %c0_i32_0 = arith.constant 0 : i32
    %c0_i32_1 = arith.constant 0 : i32
    return %c0_i32, %c0_i32_0 : i32, i32
  }
  func.func @transform_6(%arg0: i32) -> (i32, i32) {
    %c0_i32 = arith.constant 0 : i32
    %c0_i32_0 = arith.constant 0 : i32
    %c0_i32_1 = arith.constant 0 : i32
    return %c0_i32, %c0_i32_0 : i32, i32
  }
  func.func @transform_7(%arg0: i32) -> (i32, i32) {
    %c0_i32 = arith.constant 0 : i32
    %c0_i32_0 = arith.constant 0 : i32
    return %arg0, %c0_i32 : i32, i32
  }
  func.func @transform_8(%arg0: i32) -> (i32, i32) {
    %c0_i32 = arith.constant 0 : i32
    %c0_i32_0 = arith.constant 0 : i32
    return %arg0, %c0_i32 : i32, i32
  }
}

</mosaic_0001>

<bundles_post_ra>
// kernel: hierarchical_softmax.1
= control target key start
LH: loop header
LB: loop body
LE: loop exit
PB: predicated region body
PF: predicated region fallthrough
CT: control target
= control target key end

     0   :  { %14 = vsyncpa [#allocation3], 0  ;;  %s738_s0 = inlined_call_operand.vmem [shape: f32[8,32], index: 0, kind: input, shape index: {}]   ;;  %s739_s1 = inlined_call_operand.vmem [shape: bf16[32,128], index: 1, kind: input, shape index: {}]   ;;  %s740_s2 = inlined_call_operand.vmem [shape: f32[1,128], index: 2, kind: input, shape index: {}]   ;;  %s741_s3 = inlined_call_operand.hbm [shape: bf16[128,128], index: 3, kind: input, shape index: {}]   ;;  %s742_s4 = inlined_call_operand.hbm [shape: bf16[128,128], index: 4, kind: input, shape index: {}]   ;;  %s743_s5 = inlined_call_operand.vmem [shape: bf16[128,128], index: 5, kind: input, shape index: {}]   ;;  %s744_s6 = inlined_call_operand.vmem [shape: s32[1,128], index: 6, kind: input, shape index: {}]   ;;  %s745_s7 = inlined_call_operand.hbm [shape: f32[8,21], index: 7, kind: output, shape index: {0}]   ;;  %s746_s8 = inlined_call_operand.hbm [shape: f32[8,12], index: 8, kind: output, shape index: {1}]  }
   0x1   :  { %15 = vsyncpa [#allocation6], 0 }
   0x2   :  { %16 = vsyncpa [#allocation4], 0 }
   0x3   :  { %17 = vsyncpa [#allocation9], 0  ;;  %s28_s29 = sshll.u32 %s741_s3, 4  ;;  %s638_s30 = smov [#allocation2]   ;;  %s29_s29 = int_to_ptr.hbm [resolvable:$true] %s28_s29 }
   0x4   :  { %s30_s9 = sshll.u32 %s638_s30, 4  ;;  %s41_s11 = sshll.u32 %s742_s4, 4  ;;  %s31_s9 = int_to_ptr.vmem [resolvable:$true] %s30_s9  ;;  %s42_s11 = int_to_ptr.hbm [resolvable:$true] %s41_s11 }
   0x5   :  { %s639_s12 = smov 64   ;;  %s640_s13 = smov 4  }
   0x6   :  { %36 = dma.hbm_to_vmem [thread:$0]  %s29_s29, 1024, %s31_s9, [#allocation3], %s639_s12, %s639_s12, %s640_s13  }
   0x7   :  { %s641_s14 = smov [#allocation5]  }
   0x8   :  { %s43_s15 = sshll.u32 %s641_s14, 4  ;;  %s44_s15 = int_to_ptr.vmem [resolvable:$true] %s43_s15 }
   0x9   :  { %49 = dma.hbm_to_vmem [thread:$0]  %s42_s11, 1024, %s44_s15, [#allocation6], %s639_s12, %s639_s12, %s640_s13  }
   0xa   :  { %630 = dma.done.wait [#allocation3], 1024  }
   0xb   :  { %631 = vsyncadd [#allocation3], 4294966272 }
   0xc   :  { %632 = dma.done.wait [#allocation6], 1024  }
   0xd   :  { %633 = vsyncadd [#allocation6], 4294966272  ;;  %v497_v0 = vld [vmem:[%s739_s1 + $0x8] sm:$0xff]  ;;  %v496_v1 = vld [vmem:[%s739_s1] sm:$0xff]  ;;  %vm85_vm0 = vcmask 261120   ;;  %s642_s12 = smov [#allocation7]  }
   0xe   :  { %95 = vmatpush.bf16.msra.mxu0 %v497_v0  ;;  %v63_v2 = vld [vmem:[%s738_s0] sm:$0xff]  ;;  %v513_v4 = vld [vmem:[#allocation5 + $0x38] sm:$0xff]  ;;  %v512_v6 = vld [vmem:[#allocation5 + $0x30] sm:$0xff]  ;;  %s359_s13 = sshll.u32 %s642_s12, 4  ;;  %s361_s3 = sshll.u32 %s745_s7, 4  ;;  %vm346_vm3 = vcmask 171008   ;;  %s360_s13 = int_to_ptr.vmem [resolvable:$true] %s359_s13  ;;  %s362_s3 = int_to_ptr.hbm [resolvable:$true] %s361_s3 }
   0xf   :  { %v64_v3 = vpack.c.bf16 %v63_v2, %v63_v2  ;;  %v505_v5 = vld [vmem:[#allocation2 + $0x38] sm:$0xff]  ;;  %254 = vmatpush.bf16.msra.mxu2 %v513_v4  ;;  %v504_v7 = vld [vmem:[#allocation2 + $0x30] sm:$0xff]  ;;  %v511_v8 = vld [vmem:[#allocation5 + $0x28] sm:$0xff]  ;;  %s644_s16 = smov [#allocation8]   ;;  %s372_s19 = sshll.u32 %s746_s8, 4  ;;  %vm352_vm4 = vcmask 97280   ;;  %s373_s19 = int_to_ptr.hbm [resolvable:$true] %s372_s19 }
  0x10   :  { %173 = vmatpush.bf16.msra.mxu1 %v505_v5  ;;  %v503_v9 = vld [vmem:[#allocation2 + $0x28] sm:$0xff]  ;;  %v510_v10 = vld [vmem:[#allocation5 + $0x20] sm:$0xff]  ;;  %v509_v12 = vld [vmem:[#allocation5 + $0x18] sm:$0xff]  ;;  %s370_s17 = sshll.u32 %s644_s16, 4  ;;  %s371_s17 = int_to_ptr.vmem [resolvable:$true] %s370_s17 }
  0x11   :  { %v502_v11 = vld [vmem:[#allocation2 + $0x20] sm:$0xff]  ;;  %v501_v13 = vld [vmem:[#allocation2 + $0x18] sm:$0xff]  ;;  %v508_v14 = vld [vmem:[#allocation5 + $0x10] sm:$0xff] }
  0x12   :  { %96 = vmatpush.bf16.msra.mxu0 %v496_v1  ;;  %v529_v15 = vld [vmem:[%s740_s2] ss:$0 sm:$0xff]  ;;  %v507_v16 = vld [vmem:[#allocation5 + $0x8] sm:$0xff]  ;;  %v500_v21 = vld [vmem:[#allocation2 + $0x10] sm:$0xff] }
  0x13   :  { %255 = vmatpush.bf16.msra.mxu2 %v512_v6  ;;  %v506_v20 = vld [vmem:[#allocation5] sm:$0xff]  ;;  %v499_v22 = vld [vmem:[#allocation2 + $0x8] sm:$0xff]  ;;  %v521_v24 = vld [vmem:[%s743_s5 + $0x38] sm:$0xff] }
  0x14   :  { %174 = vmatpush.bf16.msra.mxu1 %v504_v7  ;;  %v498_v23 = vld [vmem:[#allocation2] sm:$0xff]  ;;  %332 = vmatpush.bf16.msra.mxu3 %v521_v24  ;;  %v520_v25 = vld [vmem:[%s743_s5 + $0x30] sm:$0xff]  ;;  %v519_v26 = vld [vmem:[%s743_s5 + $0x28] sm:$0xff] }
  0x15   :  { %396 = vmatmul.msk.bf16.vlgmr.msra.gmra.mxu0 %vm85_vm0, %v64_v3  ;;  %v518_v27 = vld [vmem:[%s743_s5 + $0x20] sm:$0xff]  ;;  %v517_v34 = vld [vmem:[%s743_s5 + $0x18] sm:$0xff]  ;;  %v516_v35 = vld [vmem:[%s743_s5 + $0x10] sm:$0xff] }
  0x16   :  { %v515_v36 = vld [vmem:[%s743_s5 + $0x8] sm:$0xff]  ;;  %v514_v37 = vld [vmem:[%s743_s5] sm:$0xff]  ;;  %s643_s5 = smov 119  }
  0x17   :  { %256 = vmatpush.bf16.msra.mxu2 %v511_v8 }
  0x18   :  { %175 = vmatpush.bf16.msra.mxu1 %v503_v9  ;;  %333 = vmatpush.bf16.msra.mxu3 %v520_v25 }
  0x1b   :  { %257 = vmatpush.bf16.msra.mxu2 %v510_v10 }
  0x1c   :  { %176 = vmatpush.bf16.msra.mxu1 %v502_v11  ;;  %334 = vmatpush.bf16.msra.mxu3 %v519_v26 }
  0x1f   :  { %258 = vmatpush.bf16.msra.mxu2 %v509_v12 }
  0x20   :  { %177 = vmatpush.bf16.msra.mxu1 %v501_v13  ;;  %335 = vmatpush.bf16.msra.mxu3 %v518_v27 }
  0x23   :  { %259 = vmatpush.bf16.msra.mxu2 %v508_v14 }
  0x24   :  { %178 = vmatpush.bf16.msra.mxu1 %v500_v21  ;;  %336 = vmatpush.bf16.msra.mxu3 %v517_v34 }
  0x27   :  { %260 = vmatpush.bf16.msra.mxu2 %v507_v16 }
  0x28   :  { %179 = vmatpush.bf16.msra.mxu1 %v499_v22  ;;  %337 = vmatpush.bf16.msra.mxu3 %v516_v35 }
  0x2b   :  { %261 = vmatpush.bf16.msra.mxu2 %v506_v20 }
  0x2c   :  { %180 = vmatpush.bf16.msra.mxu1 %v498_v23  ;;  %338 = vmatpush.bf16.msra.mxu3 %v515_v36 }
  0x30   :  { %339 = vmatpush.bf16.msra.mxu3 %v514_v37 }
  0x92   :  { %v98_v17 = vpop.f32.mrf.mxu0 }
  0x93   :  { %v99_v18 = vadd.f32 %v529_v15, %v98_v17 }
  0x95   :  { %102 = vmax.xlane.f32.xlu0 %v99_v18 }
  0x9a   :  { %v100_v19 = vpop.f32.mrf.mxu0 }
 0x108   :  { %v103_v28 = vpop.xlane.xlu0 %102 }
 0x109   :  { %v104_v29 = vsub.f32 %v99_v18, %v103_v28 }
 0x10b   :  { %v106_v30 = vmul.f32 1.442695, %v104_v29  ;;  %v105_v31 = vpack.c.bf16 %v104_v29, %v104_v29 }
 0x10d   :  { %530 = vpow2.f32 %v106_v30  ;;  %262 = vmatmul.bf16.vlgmr.msra.gmra.mxu2 %v105_v31 }
 0x113   :  { %v531_v32 = vpop.eup %530 }
 0x114   :  { %v108_v33 = vpack.c.bf16 %v531_v32, %v531_v32 }
 0x116   :  { %181 = vmatmul.bf16.vlgmr.msra.gmra.mxu1 %v108_v33 }
 0x190   :  { %v263_v38 = vpop.f32.mrf.mxu2 }
 0x193   :  { %v182_v39 = vpop.f32.mrf.mxu1 }
 0x194   :  { %532 = vlog2.f32 %v182_v39  ;;  %vm186_vm1 = vcmp.gt.f32.partialorder %v182_v39, 0.0 }
 0x195   :  { %vm493_vm2 = vmpackc.low %vm186_vm1, %vm186_vm1 }
 0x198   :  { %v265_v40 = vpop.f32.mrf.mxu2 }
 0x19a   :  { %v533_v41 = vpop.eup %532 }
 0x19b   :  { %v188_v42 = vmul.f32 0.6931472, %v533_v41  ;;  %v184_v43 = vpop.f32.mrf.mxu1 }
 0x19d   :  { %v494_v44 = vpack.c.bf16 %v188_v42, %v188_v42 }
 0x19f   :  { %495 = vmatmul.msk.bf16.vlgmr.msra.gmra.mxu3 %vm493_vm2, %v494_v44 }
 0x222   :  { %v341_v45 = vpop.f32.mrf.mxu3 }
 0x223   :  { %v345_v46 = vsub.f32 %v263_v38, %v341_v45 }
 0x225   :  { %349 = vrot.lane.b32.xlu0 %v345_v46, %s643_s5  ;;  %347 = vst.msk [vmem:[#allocation7] sm:$0xff] %vm346_vm3, %v345_v46 }
 0x226   :  { %364 = dma.vmem_to_hbm [thread:$0]  %s360_s13, 128, %s362_s3, [#allocation4]  }
 0x22a   :  { %v343_v47 = vpop.f32.mrf.mxu3 }
 0x297   :  { %v350_v48 = vpop.permute.xlu0 %349 }
 0x298   :  { %353 = vst.msk [vmem:[#allocation8] sm:$0xff] %vm352_vm4, %v350_v48 }
 0x299   :  { %375 = dma.vmem_to_hbm [thread:$0]  %s371_s17, 128, %s373_s19, [#allocation9]  }
 0x29a   :  { %634 = dma.done.wait [#allocation4], 128  }
 0x29b   :  { %635 = vsyncadd [#allocation4], 4294967168 }
 0x29c   :  { %636 = dma.done.wait [#allocation9], 128  }
 0x29d   :  { %637 = vsyncadd [#allocation9], 4294967168 }
 0x29e   :  { %384 = vsyncpa [#allocation3], 1 }
 0x29f   :  { %385 = vsyncpa [#allocation6], 1 }
 0x2a0   :  { %386 = vsyncpa [#allocation4], 1 }
 0x2a1   :  { %387 = vsyncpa [#allocation9], 1 }

</bundles_post_ra>
